<compile_context>
chip_gen: v6e
topology: v6e:2x2x1
jax: 0.10.0
libtpu: 0.0.40
codegen_flags: <defaults>
</compile_context>

<pallas_src>
import functools

import jax
import jax.numpy as jnp
from jax.experimental import pallas as pl
from jax.experimental.pallas import tpu as pltpu


def _pow_static(q, gamma):
    """(1-p)^gamma with a VPU multiply chain for small integer gamma."""
    g = float(gamma)
    if g == 0.0:
        return jnp.ones_like(q)
    if g.is_integer() and 0 < g <= 8:
        out = q
        for _ in range(int(g) - 1):
            out = out * q
        return out
    return jnp.power(q, jnp.float32(g))


# --------------------------------------------------------------------------
# Kernel A: lane-dense layout for small C.
#   preds:  (C, N)  -- classes on sublanes, rows on lanes
#   labels: (1, N)  int32
#   alpha:  (C, 1)  f32
# --------------------------------------------------------------------------
def _focal_loss_kernel_lanes(preds_ref, labels_ref, alpha_ref, out_ref, acc_ref,
                             *, gamma, n_valid, tile_cols, size_average):
    i = pl.program_id(0)

    @pl.when(i == 0)
    def _():
        acc_ref[...] = jnp.zeros_like(acc_ref)

    preds = preds_ref[...].astype(jnp.float32)        # (C, T)
    labels = labels_ref[...]                          # (1, T) int32
    alpha = alpha_ref[...].astype(jnp.float32)        # (C, 1)

    # stable log-softmax over the class (sublane) axis
    m = jnp.max(preds, axis=0, keepdims=True)
    shifted = preds - m
    lse = jnp.log(jnp.sum(jnp.exp(shifted), axis=0, keepdims=True))
    logp = shifted - lse                              # (C, T)

    cls = jax.lax.broadcasted_iota(jnp.int32, preds.shape, 0)
    onehot = (cls == labels).astype(jnp.float32)      # (C, T)

    logp_y = jnp.sum(logp * onehot, axis=0, keepdims=True)     # (1, T)
    p_y = jnp.exp(logp_y)
    alpha_y = jnp.sum(alpha * onehot, axis=0, keepdims=True)   # (1, T)

    focal = _pow_static(1.0 - p_y, gamma)
    loss = -alpha_y * focal * logp_y                           # (1, T)

    # mask rows past n_valid (ragged last tile reads unspecified data)
    col = i * tile_cols + jax.lax.broadcasted_iota(jnp.int32, loss.shape, 1)
    acc_ref[...] += jnp.where(col < n_valid, loss, 0.0)

    @pl.when(i == pl.num_programs(0) - 1)
    def _():
        total = jnp.sum(acc_ref[...])
        if size_average:
            total = total / jnp.float32(n_valid)
        out_ref[0, 0] = total


# --------------------------------------------------------------------------
# Kernel B: row-tiled layout for large C.
#   preds:  (N, C)  -- rows on sublanes, classes on lanes
#   labels: (N, 1)  int32
#   alpha:  (1, C)  f32
# --------------------------------------------------------------------------
def _focal_loss_kernel_rows(preds_ref, labels_ref, alpha_ref, out_ref, acc_ref,
                            *, gamma, n_valid, tile_rows, size_average):
    i = pl.program_id(0)

    @pl.when(i == 0)
    def _():
        acc_ref[...] = jnp.zeros_like(acc_ref)

    preds = preds_ref[...].astype(jnp.float32)        # (TM, C)
    labels = labels_ref[...]                          # (TM, 1) int32
    alpha = alpha_ref[...].astype(jnp.float32)        # (1, C)

    m = jnp.max(preds, axis=1, keepdims=True)
    shifted = preds - m
    lse = jnp.log(jnp.sum(jnp.exp(shifted), axis=1, keepdims=True))
    logp = shifted - lse                              # (TM, C)

    cls = jax.lax.broadcasted_iota(jnp.int32, preds.shape, 1)
    onehot = (cls == labels).astype(jnp.float32)      # (TM, C)

    logp_y = jnp.sum(logp * onehot, axis=1, keepdims=True)     # (TM, 1)
    p_y = jnp.exp(logp_y)
    alpha_y = jnp.sum(alpha * onehot, axis=1, keepdims=True)   # (TM, 1)

    focal = _pow_static(1.0 - p_y, gamma)
    loss = -alpha_y * focal * logp_y                           # (TM, 1)

    row = i * tile_rows + jax.lax.broadcasted_iota(jnp.int32, loss.shape, 0)
    acc_ref[...] += jnp.where(row < n_valid, loss, 0.0)

    @pl.when(i == pl.num_programs(0) - 1)
    def _():
        total = jnp.sum(acc_ref[...])
        if size_average:
            total = total / jnp.float32(n_valid)
        out_ref[0, 0] = total


def make_alpha(alpha=0.25, num_classes=2):
    """Replicates focal_loss.__init__ for scalar alpha: [alpha, 1-alpha, ...]."""
    a = jnp.zeros((num_classes,), jnp.float32)
    a = a.at[0].add(alpha)
    a = a.at[1:].add(1.0 - alpha)
    return a


def focal_loss_forward(preds, labels, alpha_vec, gamma=2, size_average=True,
                       *, small_c_threshold=16,
                       vmem_budget_bytes=8 * 1024 * 1024,
                       tile_override=None):
    """preds: [B, C] or [B, S, C]; labels: [B] or [B, S]. Returns scalar loss."""
    num_classes = preds.shape[-1]
    preds2d = preds.reshape(-1, num_classes)            # native dtype, no upcast
    labels1d = labels.reshape(-1).astype(jnp.int32)
    n = preds2d.shape[0]
    itemsize = jnp.dtype(preds2d.dtype).itemsize

    if num_classes <= small_c_threshold:
        # Lane-dense layout: classes on sublanes, rows on the 128 lanes.  The
        # one-time transpose pass is far cheaper than wasting 126/128 lanes.
        preds_in = preds2d.T                             # (C, N)
        labels_in = labels1d.reshape(1, n)               # (1, N)
        alpha_in = alpha_vec.reshape(num_classes, 1).astype(jnp.float32)

        max_cols = vmem_budget_bytes // (2 * num_classes * itemsize)
        max_cols = max(128, min(int(max_cols), 65536))
        max_cols = (max_cols // 128) * 128
        if tile_override is not None:
            tile = int(tile_override)
        elif n <= max_cols:
            tile = n                                     # single full-extent block
        else:
            tile = max_cols                              # multiple of 128, ragged last
        grid = (pl.cdiv(n, tile),)

        kernel = functools.partial(
            _focal_loss_kernel_lanes, gamma=float(gamma), n_valid=int(n),
            tile_cols=int(tile), size_average=bool(size_average))
        in_specs = [
            pl.BlockSpec((num_classes, tile), lambda i: (0, i)),
            pl.BlockSpec((1, tile), lambda i: (0, i)),
            pl.BlockSpec((num_classes, 1), lambda i: (0, 0)),
        ]
        scratch = [pltpu.VMEM((1, tile), jnp.float32)]
        args = (preds_in, labels_in, alpha_in)
    else:
        labels_in = labels1d.reshape(n, 1)               # (N, 1)
        alpha_in = alpha_vec.reshape(1, num_classes).astype(jnp.float32)

        max_rows = vmem_budget_bytes // (2 * num_classes * itemsize)
        max_rows = max(8, min(int(max_rows), 1024))
        max_rows = (max_rows // 8) * 8
        if tile_override is not None:
            tile = int(tile_override)
        elif n <= max_rows:
            tile = n
        else:
            tile = max_rows
        grid = (pl.cdiv(n, tile),)

        kernel = functools.partial(
            _focal_loss_kernel_rows, gamma=float(gamma), n_valid=int(n),
            tile_rows=int(tile), size_average=bool(size_average))
        in_specs = [
            pl.BlockSpec((tile, num_classes), lambda i: (i, 0)),
            pl.BlockSpec((tile, 1), lambda i: (i, 0)),
            pl.BlockSpec((1, num_classes), lambda i: (0, 0)),
        ]
        scratch = [pltpu.VMEM((tile, 1), jnp.float32)]
        args = (preds2d, labels_in, alpha_in)

    out = pl.pallas_call(
        kernel,
        out_shape=jax.ShapeDtypeStruct((1, 1), jnp.float32),
        grid_spec=pltpu.PrefetchScalarGridSpec(
            num_scalar_prefetch=0,
            grid=grid,
            in_specs=in_specs,
            out_specs=pl.BlockSpec((1, 1), lambda i: (0, 0),
                                   memory_space=pltpu.SMEM),
            scratch_shapes=scratch,
        ),
        compiler_params=pltpu.CompilerParams(
            dimension_semantics=("arbitrary",),      # sequential accumulation
            vmem_limit_bytes=32 * 1024 * 1024,       # safe on v5e/v6e/v7x
        ),
    )(*args)
    return out[0, 0]


def focal_loss_reference(preds, labels, alpha_vec, gamma=2, size_average=True):
    """Pure-JAX reference mirroring the PyTorch forward."""
    num_classes = preds.shape[-1]
    preds2d = preds.reshape(-1, num_classes).astype(jnp.float32)
    lab = labels.reshape(-1).astype(jnp.int32)
    logp = jax.nn.log_softmax(preds2d, axis=1)
    logp_y = jnp.take_along_axis(logp, lab[:, None], axis=1)[:, 0]
    p_y = jnp.exp(logp_y)
    alpha_y = alpha_vec[lab]
    loss = -alpha_y * jnp.power(1.0 - p_y, float(gamma)) * logp_y
    return jnp.mean(loss) if size_average else jnp.sum(loss)


if __name__ == "__main__":
    key = jax.random.PRNGKey(0)
    k1, k2, k3, k4, k5, k6 = jax.random.split(key, 6)

    # Case 1: module defaults — C=2, preds [B, S, C] f32 (lane-dense path).
    num_classes = 2
    B, S = 2, 8
    preds = jax.random.normal(k1, (B, S, num_classes), dtype=jnp.float32)
    labels = jax.random.randint(k2, (B, S), 0, num_classes, dtype=jnp.int32)
    alpha_vec = make_alpha(alpha=0.25, num_classes=num_classes)

    out = focal_loss_forward(preds, labels, alpha_vec, gamma=2,
                             size_average=True)
    out = jax.block_until_ready(out)
    ref = focal_loss_reference(preds, labels, alpha_vec, gamma=2,
                               size_average=True)
    assert jnp.allclose(out, ref, rtol=2e-5, atol=1e-6), (out, ref)

    # Case 2: bf16 preds, ragged multi-tile lane-dense path (N=300, 128 lanes
    # per tile), sum reduction — exercises the no-pad mask + VMEM accumulator.
    n2 = 300
    preds2 = jax.random.normal(k3, (n2, num_classes), dtype=jnp.bfloat16)
    labels2 = jax.random.randint(k4, (n2,), 0, num_classes, dtype=jnp.int32)
    out2 = focal_loss_forward(preds2, labels2, alpha_vec, gamma=2,
                              size_average=False, tile_override=128)
    out2 = jax.block_until_ready(out2)
    ref2 = focal_loss_reference(preds2, labels2, alpha_vec, gamma=2,
                                size_average=False)
    assert jnp.allclose(out2, ref2, rtol=1e-4, atol=1e-3), (out2, ref2)

    # Case 3: larger class count -> row-tiled path, ragged last tile, gamma=3.
    C3, n3 = 40, 100
    preds3 = jax.random.normal(k5, (n3, C3), dtype=jnp.float32)
    labels3 = jax.random.randint(k6, (n3,), 0, C3, dtype=jnp.int32)
    alpha_vec3 = make_alpha(alpha=0.25, num_classes=C3)
    out3 = focal_loss_forward(preds3, labels3, alpha_vec3, gamma=3,
                              size_average=True, tile_override=32)
    out3 = jax.block_until_ready(out3)
    ref3 = focal_loss_reference(preds3, labels3, alpha_vec3, gamma=3,
                                size_average=True)
    assert jnp.allclose(out3, ref3, rtol=2e-5, atol=1e-6), (out3, ref3)

    print("KERNEL_OK")
</pallas_src>

<mosaic_0001>
module attributes {stable_mosaic.version = 11 : i64} {
  func.func @_focal_loss_kernel_lanes(%arg0: i32, %arg1: memref<2x16xf32, #tpu.memory_space<vmem>>, %arg2: memref<1x16xi32, #tpu.memory_space<vmem>>, %arg3: memref<2x1xf32, #tpu.memory_space<vmem>>, %arg4: memref<1x1xf32, #tpu.memory_space<smem>>, %arg5: memref<1x16xf32, #tpu.memory_space<vmem>>) attributes {dimension_semantics = [#tpu.dimension_semantics<arbitrary>], iteration_bounds = array<i64: 1>, scalar_prefetch = 0 : i64, scratch_operands = 1 : i64, tpu.core_type = #tpu.core_type<tc>, window_params = [{transform_indices = @transform_0, window_bounds = array<i64: 2, 16>}, {transform_indices = @transform_1, window_bounds = array<i64: 1, 16>}, {pipeline_mode = #tpu.pipeline_mode<synchronous>, transform_indices = @transform_2, window_bounds = array<i64: 2, 1>}, {transform_indices = @transform_3, window_bounds = array<i64: 1, 1>}]} {
    %c0_i32 = arith.constant 0 : i32
    %0 = arith.cmpi eq, %arg0, %c0_i32 : i32
    %1 = arith.extui %0 : i1 to i32
    %c0_i32_0 = arith.constant 0 : i32
    %2 = arith.cmpi ne, %1, %c0_i32_0 : i32
    scf.if %2 {
      %cst_19 = arith.constant 0.000000e+00 : f32
      %50 = vector.broadcast %cst_19 : f32 to vector<1x16xf32>
      %c0_20 = arith.constant 0 : index
      %c0_21 = arith.constant 0 : index
      %51 = vector.load %arg5[%c0_20, %c0_21] : memref<1x16xf32, #tpu.memory_space<vmem>>, vector<1x16xf32>
      tpu.vector_store %arg5[%c0_20, %c0_21], %50 {strides = array<i32>} : memref<1x16xf32, #tpu.memory_space<vmem>>, vector<1x16xf32>,
    } else {
    }
    %c0 = arith.constant 0 : index
    %c0_1 = arith.constant 0 : index
    %3 = vector.load %arg1[%c0, %c0_1] : memref<2x16xf32, #tpu.memory_space<vmem>>, vector<2x16xf32>
    %c0_2 = arith.constant 0 : index
    %c0_3 = arith.constant 0 : index
    %4 = vector.load %arg2[%c0_2, %c0_3] : memref<1x16xi32, #tpu.memory_space<vmem>>, vector<1x16xi32>
    %c0_4 = arith.constant 0 : index
    %c0_5 = arith.constant 0 : index
    %5 = vector.load %arg3[%c0_4, %c0_5] : memref<2x1xf32, #tpu.memory_space<vmem>>, vector<2x1xf32>
    %cst = arith.constant dense<0xFF800000> : vector<16xf32>
    %6 = vector.multi_reduction <maximumf>, %3, %cst [0] : vector<2x16xf32> to vector<16xf32>
    %7 = vector.shape_cast %6 : vector<16xf32> to vector<1x16xf32>
    %8 = vector.broadcast %7 : vector<1x16xf32> to vector<2x16xf32>
    %9 = arith.subf %3, %8 : vector<2x16xf32>
    %10 = math.exp %9 : vector<2x16xf32>
    %cst_6 = arith.constant dense<0.000000e+00> : vector<16xf32>
    %11 = vector.multi_reduction <add>, %10, %cst_6 [0] : vector<2x16xf32> to vector<16xf32>
    %12 = vector.shape_cast %11 : vector<16xf32> to vector<1x16xf32>
    %13 = math.log %12 : vector<1x16xf32>
    %14 = vector.broadcast %13 : vector<1x16xf32> to vector<2x16xf32>
    %15 = arith.subf %9, %14 : vector<2x16xf32>
    %16 = tpu.iota {dimensions = array<i32: 0>} : vector<2x16xi32>
    %17 = vector.broadcast %4 : vector<1x16xi32> to vector<2x16xi32>
    %18 = arith.cmpi eq, %16, %17 : vector<2x16xi32>
    %19 = arith.extui %18 : vector<2x16xi1> to vector<2x16xi32>
    %20 = arith.sitofp %19 : vector<2x16xi32> to vector<2x16xf32>
    %21 = arith.mulf %15, %20 : vector<2x16xf32>
    %cst_7 = arith.constant dense<0.000000e+00> : vector<16xf32>
    %22 = vector.multi_reduction <add>, %21, %cst_7 [0] : vector<2x16xf32> to vector<16xf32>
    %23 = vector.shape_cast %22 : vector<16xf32> to vector<1x16xf32>
    %24 = math.exp %23 : vector<1x16xf32>
    %25 = vector.broadcast %5 : vector<2x1xf32> to vector<2x16xf32>
    %26 = arith.mulf %25, %20 : vector<2x16xf32>
    %cst_8 = arith.constant dense<0.000000e+00> : vector<16xf32>
    %27 = vector.multi_reduction <add>, %26, %cst_8 [0] : vector<2x16xf32> to vector<16xf32>
    %28 = vector.shape_cast %27 : vector<16xf32> to vector<1x16xf32>
    %cst_9 = arith.constant 1.000000e+00 : f32
    %29 = vector.broadcast %cst_9 : f32 to vector<1x16xf32>
    %30 = arith.subf %29, %24 : vector<1x16xf32>
    %31 = arith.mulf %30, %30 : vector<1x16xf32>
    %cst_10 = arith.constant 0.000000e+00 : f32
    %32 = vector.broadcast %cst_10 : f32 to vector<1x16xf32>
    %33 = arith.subf %32, %28 : vector<1x16xf32>
    %34 = arith.mulf %33, %31 : vector<1x16xf32>
    %35 = arith.mulf %34, %23 : vector<1x16xf32>
    %c16_i32 = arith.constant 16 : i32
    %36 = arith.muli %arg0, %c16_i32 : i32
    %37 = tpu.iota {dimensions = array<i32: 1>} : vector<1x16xi32>
    %38 = vector.broadcast %36 : i32 to vector<1x16xi32>
    %39 = arith.addi %38, %37 : vector<1x16xi32>
    %c0_11 = arith.constant 0 : index
    %c0_12 = arith.constant 0 : index
    %40 = vector.load %arg5[%c0_11, %c0_12] : memref<1x16xf32, #tpu.memory_space<vmem>>, vector<1x16xf32>
    %c16_i32_13 = arith.constant 16 : i32
    %41 = vector.broadcast %c16_i32_13 : i32 to vector<1x16xi32>
    %42 = arith.cmpi slt, %39, %41 : vector<1x16xi32>
    %cst_14 = arith.constant 0.000000e+00 : f32
    %43 = vector.broadcast %cst_14 : f32 to vector<1x16xf32>
    %44 = arith.select %42, %35, %43 : vector<1x16xi1>, vector<1x16xf32>
    %45 = arith.addf %40, %44 : vector<1x16xf32>
    %c0_15 = arith.constant 0 : index
    %c0_16 = arith.constant 0 : index
    %46 = vector.load %arg5[%c0_15, %c0_16] : memref<1x16xf32, #tpu.memory_space<vmem>>, vector<1x16xf32>
    tpu.vector_store %arg5[%c0_15, %c0_16], %45 {strides = array<i32>} : memref<1x16xf32, #tpu.memory_space<vmem>>, vector<1x16xf32>,
    %c0_i32_17 = arith.constant 0 : i32
    %47 = arith.cmpi eq, %arg0, %c0_i32_17 : i32
    %48 = arith.extui %47 : i1 to i32
    %c0_i32_18 = arith.constant 0 : i32
    %49 = arith.cmpi ne, %48, %c0_i32_18 : i32
    scf.if %49 {
      %c0_19 = arith.constant 0 : index
      %c0_20 = arith.constant 0 : index
      %50 = vector.load %arg5[%c0_19, %c0_20] : memref<1x16xf32, #tpu.memory_space<vmem>>, vector<1x16xf32>
      %51 = vector.shape_cast %50 : vector<1x16xf32> to vector<1x1x16xf32>
      %cst_21 = arith.constant dense<0.000000e+00> : vector<1xf32>
      %52 = vector.multi_reduction <add>, %51, %cst_21 [1, 2] : vector<1x1x16xf32> to vector<1xf32>
      %53 = vector.shape_cast %52 : vector<1xf32> to vector<1x1x1xf32>
      %54 = vector.extract %53[0, 0, 0] : f32 from vector<1x1x1xf32>
      %cst_22 = arith.constant 1.600000e+01 : f32
      %55 = arith.divf %54, %cst_22 : f32
      %c0_23 = arith.constant 0 : index
      %c0_24 = arith.constant 0 : index
      %56 = memref.load %arg4[%c0_23, %c0_24] : memref<1x1xf32, #tpu.memory_space<smem>>
      memref.store %55, %arg4[%c0_23, %c0_24] : memref<1x1xf32, #tpu.memory_space<smem>>
    } else {
    }
    return
  }
  func.func @transform_0(%arg0: i32) -> (i32, i32) {
    %c0_i32 = arith.constant 0 : i32
    %c0_i32_0 = arith.constant 0 : i32
    return %c0_i32, %arg0 : i32, i32
  }
  func.func @transform_1(%arg0: i32) -> (i32, i32) {
    %c0_i32 = arith.constant 0 : i32
    %c0_i32_0 = arith.constant 0 : i32
    return %c0_i32, %arg0 : i32, i32
  }
  func.func @transform_2(%arg0: i32) -> (i32, i32) {
    %c0_i32 = arith.constant 0 : i32
    %c0_i32_0 = arith.constant 0 : i32
    %c0_i32_1 = arith.constant 0 : i32
    return %c0_i32, %c0_i32_0 : i32, i32
  }
  func.func @transform_3(%arg0: i32) -> (i32, i32) {
    %c0_i32 = arith.constant 0 : i32
    %c0_i32_0 = arith.constant 0 : i32
    %c0_i32_1 = arith.constant 0 : i32
    return %c0_i32, %c0_i32_0 : i32, i32
  }
}

</mosaic_0001>

<bundles_post_ra>
// kernel: tpu_custom_call.1
= control target key start
LH: loop header
LB: loop body
LE: loop exit
PB: predicated region body
PF: predicated region fallthrough
CT: control target
= control target key end

     0   :  { %vm24_vm0 = vcmask 123904   ;;  %v149_v1 = vmov 0   ;;  %s191_s0 = inlined_call_operand.vmem [shape: f32[2,16], index: 0, kind: input, shape index: {}]   ;;  %s192_s1 = inlined_call_operand.vmem [shape: s32[1,16], index: 1, kind: input, shape index: {}]   ;;  %s193_s2 = inlined_call_operand.vmem [shape: f32[2,1], index: 2, kind: input, shape index: {}]   ;;  %s194_s3 = inlined_call_operand.hbm [shape: f32[1,1], index: 3, kind: output, shape index: {}]  }
   0x1   :  { %v23_v0 = vld [vmem:[%s193_s2] sm:$0x3]  ;;  %132 = vset.pattern.permute.xlu0 %v149_v1 }
   0x2   :  { %v21_v2 = vld [vmem:[%s191_s0] sm:$0x3] }
   0x3   :  { %8 = vsyncpa [#allocation4], 0  ;;  %66 = vperm.xlu0 %132, %v23_v0   ;;  %v25_v3 = vsel %vm24_vm0, %v21_v2, -inf  ;;  %vm19_vm1 = vcmask 122880   ;;  %v150_v9 = vmov 0.0   ;;  %v45_v21 = vlaneseq  ;;  %s151_s17 = smov [#allocation3]  }
   0x4   :  { %v26_v4 = vrot.slane %v25_v3, 4  ;;  %20 = vst.msk [vmem:[#allocation2] sm:$0x1] %vm19_vm1, %v150_v9  ;;  %v125_v24 = vld [vmem:[%s192_s1] ss:$0 sm:$0xff] }
   0x5   :  { %v46_v23 = vshrl.u32 %v45_v21, 7  ;;  %v84_v49 = vand.u32 127, %v45_v21 }
   0x6   :  { %v27_v5 = vmax.f32 %v25_v3, %v26_v4 }
   0x7   :  { %vm51_vm2 = vcmp.eq.s32.totalorder %v46_v23, %v125_v24  ;;  %vm88_vm3 = vcmp.lt.s32.totalorder %v84_v49, 16 }
   0x8   :  { %v28_v6 = vrot.slane %v27_v5, 2  ;;  %v126_v27 = vsel %vm51_vm2, 1.0, %v150_v9 }
   0xa   :  { %v29_v7 = vmax.f32 %v27_v5, %v28_v6 }
   0xb   :  { %v87_v53 = vld [vmem:[#allocation2] sm:$0x1] }
   0xc   :  { %v30_v8 = vrot.slane %v29_v7, 1 }
   0xe   :  { %v31_v10 = vmax.f32 %v29_v7, %v30_v8 }
  0x10   :  { %v32_v11 = vsub.f32 %v21_v2, %v31_v10 }
  0x12   :  { %v33_v12 = vmul.f32 1.442695, %v32_v11 }
  0x14   :  { %133 = vpow2.f32 %v33_v12 }
  0x21   :  { %v134_v13 = vpop.eup %133 }
  0x22   :  { %v35_v14 = vsel %vm24_vm0, %v134_v13, 0.0 }
  0x23   :  { %v36_v15 = vrot.slane %v35_v14, 4 }
  0x25   :  { %v37_v16 = vadd.f32 %v36_v15, %v35_v14 }
  0x27   :  { %v38_v17 = vrot.slane %v37_v16, 2 }
  0x29   :  { %v39_v18 = vadd.f32 %v38_v17, %v37_v16 }
  0x2b   :  { %v40_v19 = vrot.slane %v39_v18, 1 }
  0x2d   :  { %v41_v20 = vadd.f32 %v40_v19, %v39_v18 }
  0x2f   :  { %135 = vlog2.f32 %v41_v20 }
  0x3c   :  { %v136_v22 = vpop.eup %135 }
  0x3d   :  { %v43_v25 = vmul.f32 0.6931472, %v136_v22 }
  0x3f   :  { %v44_v26 = vsub.f32 %v32_v11, %v43_v25 }
  0x41   :  { %v54_v28 = vmul.f32 %v126_v27, %v44_v26 }
  0x43   :  { %v55_v29 = vsel %vm24_vm0, %v54_v28, 0.0 }
  0x44   :  { %v56_v30 = vrot.slane %v55_v29, 4 }
  0x46   :  { %v57_v31 = vadd.f32 %v56_v30, %v55_v29 }
  0x48   :  { %v58_v32 = vrot.slane %v57_v31, 2 }
  0x4a   :  { %v59_v33 = vadd.f32 %v58_v32, %v57_v31 }
  0x4c   :  { %v60_v34 = vrot.slane %v59_v33, 1 }
  0x4e   :  { %v61_v35 = vadd.f32 %v60_v34, %v59_v33 }
  0x50   :  { %v62_v36 = vmul.f32 1.442695, %v61_v35 }
  0x52   :  { %137 = vpow2.f32 %v62_v36 }
  0x5f   :  { %v138_v42 = vpop.eup %137 }
  0x60   :  { %v77_v45 = vsub.f32 1.0, %v138_v42 }
  0x62   :  { %v78_v48 = vmul.f32 %v77_v45, %v77_v45 }
  0x7e   :  { %v67_v37 = vpop.permute.xlu0 %66 }
  0x7f   :  { %v69_v38 = vmul.f32 %v126_v27, %v67_v37 }
  0x81   :  { %v70_v39 = vsel %vm24_vm0, %v69_v38, 0.0 }
  0x82   :  { %v71_v40 = vrot.slane %v70_v39, 4 }
  0x84   :  { %v72_v41 = vadd.f32 %v71_v40, %v70_v39 }
  0x86   :  { %v73_v43 = vrot.slane %v72_v41, 2 }
  0x88   :  { %v74_v44 = vadd.f32 %v73_v43, %v72_v41 }
  0x8a   :  { %v75_v46 = vrot.slane %v74_v44, 1 }
  0x8c   :  { %v76_v47 = vadd.f32 %v75_v46, %v74_v44 }
  0x8e   :  { %v79_v50 = vsub.f32 0.0, %v76_v47 }
  0x90   :  { %v80_v51 = vmul.f32 %v79_v50, %v78_v48 }
  0x92   :  { %v81_v52 = vmul.f32 %v80_v51, %v61_v35 }
  0x94   :  { %v89_v54 = vsel %vm88_vm3, %v81_v52, 0.0 }
  0x95   :  { %v90_v55 = vadd.f32 %v89_v54, %v87_v53 }
  0x97   :  { %92 = vst.msk [vmem:[#allocation2] sm:$0x1] %vm19_vm1, %v90_v55 }
  0x9e   :  { %v96_v56 = vld [vmem:[#allocation2] sm:$0x1] }
  0x9f   :  { %v97_v57 = vsel %vm19_vm1, %v96_v56, 0.0 }
  0xa0   :  { %98 = vadd.xlane.f32.xlu0 %v97_v57 }
 0x129   :  { %v99_v58 = vpop.xlane.xlu0 %98 }
 0x12a   :  { %v100_v59 = vrot.slane %v99_v58, 4 }
 0x12c   :  { %v101_v60 = vadd.f32 %v100_v59, %v99_v58 }
 0x12e   :  { %v102_v61 = vrot.slane %v101_v60, 2 }
 0x130   :  { %v103_v62 = vadd.f32 %v102_v61, %v101_v60 }
 0x132   :  { %v104_v63 = vrot.slane %v103_v62, 1 }
 0x134   :  { %v105_v0 = vadd.f32 %v104_v63, %v103_v62 }
 0x136   :  { %127 = vpush %v105_v0 }
 0x167   :  { %s128_s1 = spop %127 }
 0x168   :  { %s109_s16 = smul.f32 0.0625, %s128_s1 }
 0x16a   :  { %111 = sst [smem:[#allocation3]] %s109_s16 }
 0x16b   :  { %119 = dma.smem_to_hbm %s151_s17, 16, %s194_s3, [#allocation4]  }
 0x16c   :  { %147 = dma.done.wait [#allocation4], 16  }
 0x16d   :  { %148 = vsyncadd [#allocation4], 4294967280 }
 0x16e   :  { %123 = sfence }
 0x16f   :  { %124 = vsyncpa [#allocation4], 1 }

</bundles_post_ra>
